<compile_context>
chip_gen: v7x
topology: tpu7x:2x2x1
jax: 0.10.0
libtpu: 0.0.40
codegen_flags: <defaults>
</compile_context>

<pallas_src>
import functools

import jax
import jax.numpy as jnp
from jax.experimental import pallas as pl
from jax.experimental.pallas import tpu as pltpu


def _trojan_kernel(scalars_ref,        # SMEM scalar prefetch: [thrd, sigmoid_flag]
                   x_ref, w_ref, b_ref,
                   feat_ref, edge_ref,
                   *, sigmoid_mode):
    """One row-tile: fused matmul for both heads, then per-head activation.

    sigmoid_mode: None  -> decide at runtime from scalars_ref[1] (pl.when gated)
                  True  -> always sigmoid (trace-time specialization)
                  False -> never sigmoid
    """
    thrd = scalars_ref[0]
    d_feat_pad = feat_ref.shape[-1]        # static, multiple of 128

    h = x_ref[...]                                                     # [TM, n_feat]
    fused = jnp.dot(h, w_ref[...], preferred_element_type=jnp.float32)
    fused = fused + b_ref[...]                                         # [TM, d_fused]

    # Static, lane-aligned slices (d_feat_pad is a multiple of 128).
    feat_pre = fused[:, :d_feat_pad]
    edge_pre = fused[:, d_feat_pad:]

    # Edge head: GradWhere forward (strict '>' like torch.where(input > thrd, 1, 0)).
    edge_ref[...] = jnp.where(edge_pre > thrd, 1.0, 0.0).astype(edge_ref.dtype)

    # Feat head: sigmoid only when the raw input was in [0, 1].
    if sigmoid_mode is None:
        sig_flag = scalars_ref[1]

        @pl.when(sig_flag > 0.5)
        def _():
            feat_ref[...] = jax.nn.sigmoid(feat_pre).astype(feat_ref.dtype)

        @pl.when(sig_flag <= 0.5)
        def _():
            feat_ref[...] = feat_pre.astype(feat_ref.dtype)
    elif sigmoid_mode:
        feat_ref[...] = jax.nn.sigmoid(feat_pre).astype(feat_ref.dtype)
    else:
        feat_ref[...] = feat_pre.astype(feat_ref.dtype)


def _round_up(v, m):
    return (v + m - 1) // m * m


def graph_trojan_net_forward(x, w_feat, b_feat, w_edge, b_edge, thrd,
                             *, input_in_unit_range=None, tm=None):
    """x: [N, n_feat] f32; w_feat: [n_feat, n_out*n_feat]; w_edge: [n_feat, n_edge].

    Weights are stored pre-transposed as [in_features, out_features].
    input_in_unit_range: optional static Python bool. If provided, the sigmoid
      decision is baked in at trace time and the wrapper-side min/max reduction
      over x (an extra HBM pass) is skipped.
    """
    N, n_feat = x.shape
    d_feat = w_feat.shape[1]
    d_edge = w_edge.shape[1]

    # Lane-dense padded widths (multiples of 128) for the fused weight / outputs.
    d_feat_pad = _round_up(d_feat, 128)
    d_edge_pad = _round_up(d_edge, 128)
    d_fused = d_feat_pad + d_edge_pad

    # Fused, zero-padded weight [n_feat, d_fused] and bias [1, d_fused].
    w_fused = jnp.zeros((n_feat, d_fused), jnp.float32)
    w_fused = w_fused.at[:, :d_feat].set(w_feat.astype(jnp.float32))
    w_fused = w_fused.at[:, d_feat_pad:d_feat_pad + d_edge].set(w_edge.astype(jnp.float32))
    b_fused = jnp.zeros((1, d_fused), jnp.float32)
    b_fused = b_fused.at[0, :d_feat].set(b_feat.astype(jnp.float32))
    b_fused = b_fused.at[0, d_feat_pad:d_feat_pad + d_edge].set(b_edge.astype(jnp.float32))

    # Sigmoid condition (PyTorch does .item() on min/max of the raw input).
    if input_in_unit_range is None:
        flag = jnp.logical_and(jnp.max(x) <= 1.0, jnp.min(x) >= 0.0).astype(jnp.float32)
    else:
        flag = jnp.float32(1.0 if input_in_unit_range else 0.0)
    scalars = jnp.stack([jnp.asarray(thrd, dtype=jnp.float32), flag])

    # Row-tile size: big enough to pipeline, capped for v7x's smaller VMEM.
    if tm is None:
        tm = 512
    if tm >= N:
        tm = N                                  # single block == full dim is allowed
    else:
        tm = max(8, (tm // 8) * 8)              # (8,128) sublane constraint
    # Keep double-buffered x/out blocks (+ resident weights) well under the
    # ~32 MiB scoped-VMEM default that also holds on v7x (64 MiB physical).
    bytes_per_row = 4 * (n_feat + d_feat_pad + d_edge_pad)
    vmem_cap_rows = max(8, ((24 << 20) // (2 * bytes_per_row)) // 8 * 8)
    tm = min(tm, max(vmem_cap_rows, 8)) if tm != N else tm

    grid = (pl.cdiv(N, tm),)

    grid_spec = pltpu.PrefetchScalarGridSpec(
        num_scalar_prefetch=1,
        grid=grid,
        in_specs=[
            pl.BlockSpec((tm, n_feat), lambda i, s: (i, 0)),        # x row-tile
            pl.BlockSpec((n_feat, d_fused), lambda i, s: (0, 0)),   # fused W, resident
            pl.BlockSpec((1, d_fused), lambda i, s: (0, 0)),        # fused b, resident
        ],
        out_specs=[
            pl.BlockSpec((tm, d_feat_pad), lambda i, s: (i, 0)),
            pl.BlockSpec((tm, d_edge_pad), lambda i, s: (i, 0)),
        ],
    )

    feat_pad, edge_pad = pl.pallas_call(
        functools.partial(_trojan_kernel, sigmoid_mode=input_in_unit_range),
        out_shape=(jax.ShapeDtypeStruct((N, d_feat_pad), jnp.float32),
                   jax.ShapeDtypeStruct((N, d_edge_pad), jnp.float32)),
        grid_spec=grid_spec,
        compiler_params=pltpu.CompilerParams(
            dimension_semantics=("parallel",)),     # megacore-sharded on v7x
    )(scalars, x, w_fused, b_fused)

    # Slice off the lane padding (layout plumbing only).
    return feat_pad[:, :d_feat], edge_pad[:, :d_edge]


def _reference(x, w_feat, b_feat, w_edge, b_edge, thrd):
    h = x
    feat_pre = h @ w_feat + b_feat
    in_unit = jnp.logical_and(jnp.max(x) <= 1.0, jnp.min(x) >= 0.0)
    feat = jnp.where(in_unit, jax.nn.sigmoid(feat_pre), feat_pre)
    edge_pre = h @ w_edge + b_edge
    edge = jnp.where(edge_pre > thrd, 1.0, 0.0)
    return feat, edge


if __name__ == "__main__":
    # Small shapes consistent with the module: N nodes, n_feat features, n_out trigger nodes.
    N, n_feat, n_out = 8, 32, 8
    d_feat = n_out * n_feat              # 256
    d_edge = n_out * (n_out - 1) // 2    # 28
    thrd = 0.0

    key = jax.random.PRNGKey(0)
    kx, kwf, kbf, kwe, kbe = jax.random.split(key, 5)

    # Input in [0,1] so the sigmoid branch is exercised (like normalized node features).
    x = jax.random.uniform(kx, (N, n_feat), dtype=jnp.float32)

    # Deterministic synthetic parameters, stored as [in, out].
    w_feat = 0.1 * jax.random.normal(kwf, (n_feat, d_feat), dtype=jnp.float32)
    b_feat = 0.1 * jax.random.normal(kbf, (d_feat,), dtype=jnp.float32)
    w_edge = 0.1 * jax.random.normal(kwe, (n_feat, d_edge), dtype=jnp.float32)
    b_edge = 0.1 * jax.random.normal(kbe, (d_edge,), dtype=jnp.float32)

    # 1) Dynamic flag path, input in [0,1] -> sigmoid branch.
    feat, edge_weight = graph_trojan_net_forward(x, w_feat, b_feat, w_edge, b_edge, thrd)
    jax.block_until_ready((feat, edge_weight))
    ref_feat, ref_edge = _reference(x, w_feat, b_feat, w_edge, b_edge, thrd)
    assert feat.shape == (N, d_feat) and edge_weight.shape == (N, d_edge)
    assert jnp.allclose(feat, ref_feat, atol=1e-5)
    assert jnp.allclose(edge_weight, ref_edge)

    # 2) Dynamic flag path, input outside [0,1] -> raw (no-sigmoid) branch.
    x2 = 3.0 * x - 1.0
    feat2, edge2 = graph_trojan_net_forward(x2, w_feat, b_feat, w_edge, b_edge, thrd)
    jax.block_until_ready((feat2, edge2))
    ref_feat2, ref_edge2 = _reference(x2, w_feat, b_feat, w_edge, b_edge, thrd)
    assert jnp.allclose(feat2, ref_feat2, atol=1e-5)
    assert jnp.allclose(edge2, ref_edge2)

    # 3) Static specialization path (skips the wrapper min/max pass over x).
    feat3, edge3 = graph_trojan_net_forward(
        x, w_feat, b_feat, w_edge, b_edge, thrd, input_in_unit_range=True)
    jax.block_until_ready((feat3, edge3))
    assert jnp.allclose(feat3, ref_feat, atol=1e-5)
    assert jnp.allclose(edge3, ref_edge)

    print("KERNEL_OK")
</pallas_src>

<mosaic_0001>
module attributes {stable_mosaic.version = 11 : i64} {
  func.func @_trojan_kernel(%arg0: i32, %arg1: memref<2xf32, #tpu.memory_space<smem>>, %arg2: memref<8x32xf32, #tpu.memory_space<vmem>>, %arg3: memref<32x384xf32, #tpu.memory_space<vmem>>, %arg4: memref<1x384xf32, #tpu.memory_space<vmem>>, %arg5: memref<8x256xf32, #tpu.memory_space<vmem>>, %arg6: memref<8x128xf32, #tpu.memory_space<vmem>>) attributes {dimension_semantics = [#tpu.dimension_semantics<parallel>], iteration_bounds = array<i64: 1>, scalar_prefetch = 1 : i64, scratch_operands = 0 : i64, tpu.core_type = #tpu.core_type<tc>, window_params = [{transform_indices = @transform_0, window_bounds = array<i64: 8, 32>}, {pipeline_mode = #tpu.pipeline_mode<synchronous>, transform_indices = @transform_1, window_bounds = array<i64: 32, 384>}, {pipeline_mode = #tpu.pipeline_mode<synchronous>, transform_indices = @transform_2, window_bounds = array<i64: 1, 384>}, {transform_indices = @transform_3, window_bounds = array<i64: 8, 256>}, {transform_indices = @transform_4, window_bounds = array<i64: 8, 128>}]} {
    %c0 = arith.constant 0 : index
    %0 = memref.load %arg1[%c0] : memref<2xf32, #tpu.memory_space<smem>>
    %c0_0 = arith.constant 0 : index
    %c0_1 = arith.constant 0 : index
    %1 = vector.load %arg2[%c0_0, %c0_1] : memref<8x32xf32, #tpu.memory_space<vmem>>, vector<8x32xf32>
    %c0_2 = arith.constant 0 : index
    %c0_3 = arith.constant 0 : index
    %2 = vector.load %arg3[%c0_2, %c0_3] : memref<32x384xf32, #tpu.memory_space<vmem>>, vector<32x384xf32>
    %cst = arith.constant dense<0.000000e+00> : vector<8x384xf32>
    %3 = tpu.matmul %1, %2, %cst {dimension_numbers = #tpu.dot_dimension_numbers<[1], [0], [0], [1], [0, 0, 1, 1], [], []>} : vector<8x32xf32>, vector<32x384xf32>, vector<8x384xf32> -> vector<8x384xf32>
    %c0_4 = arith.constant 0 : index
    %c0_5 = arith.constant 0 : index
    %4 = vector.load %arg4[%c0_4, %c0_5] : memref<1x384xf32, #tpu.memory_space<vmem>>, vector<1x384xf32>
    %5 = vector.broadcast %4 : vector<1x384xf32> to vector<8x384xf32>
    %6 = arith.addf %3, %5 : vector<8x384xf32>
    %7 = vector.extract_strided_slice %6 {offsets = [0, 0], sizes = [8, 256], strides = [1, 1]} : vector<8x384xf32> to vector<8x256xf32>
    %8 = vector.extract_strided_slice %6 {offsets = [0, 256], sizes = [8, 128], strides = [1, 1]} : vector<8x384xf32> to vector<8x128xf32>
    %9 = vector.broadcast %0 : f32 to vector<8x128xf32>
    %10 = arith.cmpf ogt, %8, %9 : vector<8x128xf32>
    %cst_6 = arith.constant 1.000000e+00 : f32
    %cst_7 = arith.constant 0.000000e+00 : f32
    %11 = vector.broadcast %cst_6 : f32 to vector<8x128xf32>
    %12 = vector.broadcast %cst_7 : f32 to vector<8x128xf32>
    %13 = arith.select %10, %11, %12 : vector<8x128xi1>, vector<8x128xf32>
    %c0_8 = arith.constant 0 : index
    %c0_9 = arith.constant 0 : index
    %14 = vector.load %arg6[%c0_8, %c0_9] : memref<8x128xf32, #tpu.memory_space<vmem>>, vector<8x128xf32>
    tpu.vector_store %arg6[%c0_8, %c0_9], %13 {strides = array<i32>} : memref<8x128xf32, #tpu.memory_space<vmem>>, vector<8x128xf32>,
    %c1 = arith.constant 1 : index
    %15 = memref.load %arg1[%c1] : memref<2xf32, #tpu.memory_space<smem>>
    %cst_10 = arith.constant 5.000000e-01 : f32
    %16 = arith.cmpf ogt, %15, %cst_10 : f32
    %17 = arith.extui %16 : i1 to i32
    %c0_i32 = arith.constant 0 : i32
    %18 = arith.cmpi ne, %17, %c0_i32 : i32
    scf.if %18 {
      %22 = arith.negf %7 : vector<8x256xf32>
      %23 = math.exp %22 : vector<8x256xf32>
      %cst_13 = arith.constant 1.000000e+00 : f32
      %24 = vector.broadcast %cst_13 : f32 to vector<8x256xf32>
      %25 = arith.addf %24, %23 : vector<8x256xf32>
      %26 = arith.divf %24, %25 : vector<8x256xf32>
      %c0_14 = arith.constant 0 : index
      %c0_15 = arith.constant 0 : index
      %27 = vector.load %arg5[%c0_14, %c0_15] : memref<8x256xf32, #tpu.memory_space<vmem>>, vector<8x256xf32>
      tpu.vector_store %arg5[%c0_14, %c0_15], %26 {strides = array<i32>} : memref<8x256xf32, #tpu.memory_space<vmem>>, vector<8x256xf32>,
    } else {
    }
    %cst_11 = arith.constant 5.000000e-01 : f32
    %19 = arith.cmpf ole, %15, %cst_11 : f32
    %20 = arith.extui %19 : i1 to i32
    %c0_i32_12 = arith.constant 0 : i32
    %21 = arith.cmpi ne, %20, %c0_i32_12 : i32
    scf.if %21 {
      %c0_13 = arith.constant 0 : index
      %c0_14 = arith.constant 0 : index
      %22 = vector.load %arg5[%c0_13, %c0_14] : memref<8x256xf32, #tpu.memory_space<vmem>>, vector<8x256xf32>
      tpu.vector_store %arg5[%c0_13, %c0_14], %7 {strides = array<i32>} : memref<8x256xf32, #tpu.memory_space<vmem>>, vector<8x256xf32>,
    } else {
    }
    return
  }
  func.func @transform_0(%arg0: i32, %arg1: memref<2xf32, #tpu.memory_space<smem>>) -> (i32, i32) {
    %c0_i32 = arith.constant 0 : i32
    %c0_i32_0 = arith.constant 0 : i32
    return %arg0, %c0_i32 : i32, i32
  }
  func.func @transform_1(%arg0: i32, %arg1: memref<2xf32, #tpu.memory_space<smem>>) -> (i32, i32) {
    %c0_i32 = arith.constant 0 : i32
    %c0_i32_0 = arith.constant 0 : i32
    %c0_i32_1 = arith.constant 0 : i32
    return %c0_i32, %c0_i32_0 : i32, i32
  }
  func.func @transform_2(%arg0: i32, %arg1: memref<2xf32, #tpu.memory_space<smem>>) -> (i32, i32) {
    %c0_i32 = arith.constant 0 : i32
    %c0_i32_0 = arith.constant 0 : i32
    %c0_i32_1 = arith.constant 0 : i32
    return %c0_i32, %c0_i32_0 : i32, i32
  }
  func.func @transform_3(%arg0: i32, %arg1: memref<2xf32, #tpu.memory_space<smem>>) -> (i32, i32) {
    %c0_i32 = arith.constant 0 : i32
    %c0_i32_0 = arith.constant 0 : i32
    return %arg0, %c0_i32 : i32, i32
  }
  func.func @transform_4(%arg0: i32, %arg1: memref<2xf32, #tpu.memory_space<smem>>) -> (i32, i32) {
    %c0_i32 = arith.constant 0 : i32
    %c0_i32_0 = arith.constant 0 : i32
    return %arg0, %c0_i32 : i32, i32
  }
}

</mosaic_0001>

<bundles_post_ra>
// kernel: tpu_custom_call.1
= control target key start
LH: loop header
LB: loop body
LE: loop exit
PB: predicated region body
PF: predicated region fallthrough
CT: control target
= control target key end

     0   :  { %s561_s0 = inlined_call_operand.hbm [shape: f32[2], index: 0, kind: input, shape index: {}]   ;;  %s562_s1 = inlined_call_operand.hbm [shape: f32[8,32], index: 1, kind: input, shape index: {}]   ;;  %s563_s2 = inlined_call_operand.hbm [shape: f32[32,384], index: 2, kind: input, shape index: {}]   ;;  %s564_s3 = inlined_call_operand.vmem [shape: f32[1,384], index: 3, kind: input, shape index: {}]   ;;  %s565_s4 = inlined_call_operand.hbm [shape: f32[8,256], index: 4, kind: output, shape index: {0}]   ;;  %s566_s5 = inlined_call_operand.hbm [shape: f32[8,128], index: 5, kind: output, shape index: {1}]  }
   0x1   :  { %s337_s20 = scalar_lea.hbm %s561_s0, 16 }
   0x2   :  { %p338_p0 = scmp.ne.s32.totalorder %s561_s0, %s337_s20  ;;  %p341_p1 = scmp.lt.u32.totalorder %s337_s20, %s561_s0 }
   0x4   :  { %p343_p2 = pnand %p341_p1, %p338_p0 }
   0x6   :  { %346 = shalt.err (!%p343_p2)  }
   0x7   :  { %s445_s25 = smov [#allocation3]  }
   0x8   :  { %12 = dma.hbm_to_smem %s561_s0, 16, %s445_s25, [#allocation2] }
   0x9   :  { %435 = dma.done.wait [#allocation2], 16 }
   0xa   :  { %436 = vsyncadd [#allocation2], 4294967280 }
   0xb   :  { %14 = sfence }
   0xc   :  { %15 = vsyncpa [#allocation5], 0 }
   0xd   :  { %16 = vsyncpa [#allocation8], 0 }
   0xe   :  { %17 = vsyncpa [#allocation6], 0 }
   0xf   :  { %18 = vsyncpa [#allocation11], 0  ;;  %s446_s28 = smov [#allocation4]   ;;  %s447_s30 = smov [#allocation7]  }
  0x10   :  { %s25_s29 = sshll.u32 %s446_s28, 4  ;;  %s34_s6 = sshll.u32 %s447_s30, 4  ;;  %s26_s29 = int_to_ptr.vmem [resolvable:$true] %s25_s29  ;;  %s497_s6 = int_to_ptr.vmem [resolvable:$true] %s34_s6 }
  0x11   :  { %s347_s9 = scalar_lea.hbm %s562_s1, 128 }
  0x12   :  { %p348_p3 = scmp.ne.s32.totalorder %s562_s1, %s347_s9  ;;  %p351_p4 = scmp.lt.u32.totalorder %s347_s9, %s562_s1 }
  0x14   :  { %p353_p5 = pnand %p351_p4, %p348_p3 }
  0x16   :  { %356 = shalt.err (!%p353_p5)
}
  0x17   :  { %s357_s13 = scalar_lea.vmem %s26_s29, 128  ;;  %p362_p7 = scmp.lt.s32.totalorder %s26_s29, %s26_s29 }
  0x18   :  { %p358_p6 = scmp.ne.s32.totalorder %s26_s29, %s357_s13  ;;  %p363_p8 = scmp.lt.s32.totalorder %s357_s13, %s357_s13 }
  0x1a   :  { %p364_p9 = por %p363_p8, %p362_p7 }
  0x1c   :  { %p365_p10 = pnand %p364_p9, %p358_p6 }
  0x1e   :  { %368 = shalt.err (!%p365_p10)
}
  0x1f   :  { %28 = dma.hbm_to_vmem [thread:$0]  %s562_s1, 128, %s26_s29, [#allocation5]  }
  0x20   :  { %s369_s18 = scalar_lea.hbm %s563_s2, 1536 }
  0x21   :  { %p370_p11 = scmp.ne.s32.totalorder %s563_s2, %s369_s18  ;;  %p373_p12 = scmp.lt.u32.totalorder %s369_s18, %s563_s2 }
  0x23   :  { %p375_p13 = pnand %p373_p12, %p370_p11 }
  0x25   :  { %378 = shalt.err (!%p375_p13)
}
  0x26   :  { %s379_s23 = scalar_lea.vmem %s497_s6, 1536  ;;  %p384_p1 = scmp.lt.s32.totalorder %s497_s6, %s497_s6 }
  0x27   :  { %p380_p0 = scmp.ne.s32.totalorder %s497_s6, %s379_s23  ;;  %p385_p2 = scmp.lt.s32.totalorder %s379_s23, %s379_s23 }
  0x29   :  { %p386_p3 = por %p385_p2, %p384_p1 }
  0x2b   :  { %p387_p4 = pnand %p386_p3, %p380_p0 }
  0x2d   :  { %390 = shalt.err (!%p387_p4)
}
  0x2e   :  { %s448_s1 = smov 384   ;;  %s449_s24 = smov 24  }
  0x2f   :  { %40 = dma.hbm_to_vmem [thread:$0]  %s563_s2, 1536, %s497_s6, [#allocation8], %s448_s1, %s448_s1, %s449_s24  }
  0x30   :  { %437 = dma.done.wait [#allocation5], 128  }
  0x31   :  { %438 = vsyncadd [#allocation5], 4294967168 }
  0x32   :  { %439 = dma.done.wait [#allocation8], 1536  }
  0x33   :  { %440 = vsyncadd [#allocation8], 4294965760  ;;  %s528_s27 = sld [smem:[#allocation3 + $0x1]]  ;;  %v450_v0 = vmov 0.0|0.0   ;;  %vm451_vm0 = vmmov 0   ;;  %v452_v1 = vmov 0.0   ;;  %v65_v21 = vlaneseq }
  0x34   :  { %313 = vmatprep.subr.bf16.mxu1 %v450_v0  ;;  %302 = vmatprep.mubr.msk.f32.mxu1 %vm451_vm0, %v452_v1  ;;  %v53_v2 = vld [vmem:[#allocation7 + $0x10] sm:$0xff]  ;;  %v56_v3 = vld [vmem:[#allocation7 + $0x28] sm:$0xff]  ;;  %v55_v6 = vld [vmem:[#allocation7 + $0x20] sm:$0xff]  ;;  %vm80_vm1 = vcmask 261120   ;;  %s49_s2 = sld [smem:[#allocation3]] }
  0x35   :  { %148 = vmatprep.mubr.f32.mxu0 %v452_v1  ;;  %v52_v4 = vld [vmem:[#allocation7 + $0x8] sm:$0xff]  ;;  %v314_v5 = vpack.c.bf16 %v56_v3, %v53_v2  ;;  %v51_v7 = vld [vmem:[#allocation7] sm:$0xff]  ;;  %v54_v8 = vld [vmem:[#allocation7 + $0x18] sm:$0xff]  ;;  %v66_v22 = vshrl.u32 %v65_v21, 7 }
  0x36   :  { %v305_v9 = vpack.c.bf16 %v55_v6, %v52_v4  ;;  %v307_v10 = vpack.c.bf16 %v54_v8, %v51_v7  ;;  %v59_v11 = vld [vmem:[#allocation7 + $0x40] sm:$0xff]  ;;  %v62_v12 = vld [vmem:[#allocation7 + $0x58] sm:$0xff]  ;;  %v61_v15 = vld [vmem:[#allocation7 + $0x50] sm:$0xff] }
  0x37   :  { %v58_v13 = vld [vmem:[#allocation7 + $0x38] sm:$0xff]  ;;  %315 = vmatpush3.bf16.msra.mxu1 %v314_v5  ;;  %v317_v14 = vpack.c.bf16 %v62_v12, %v59_v11  ;;  %v57_v16 = vld [vmem:[#allocation7 + $0x30] sm:$0xff]  ;;  %v60_v17 = vld [vmem:[#allocation7 + $0x48] sm:$0xff]  ;;  %v75_v23 = vsub.s32 2, %v66_v22  ;;  %v67_v25 = vsub.s32 0, %v66_v22  ;;  %v71_v26 = vsub.s32 1, %v66_v22 }
  0x38   :  { %306 = vmatprep.subr.bf16.mxu0 %v305_v9  ;;  %316 = vmatprep.subr.bf16.mxu1 %v450_v0  ;;  %v309_v18 = vpack.c.bf16 %v61_v15, %v58_v13  ;;  %v311_v19 = vpack.c.bf16 %v60_v17, %v57_v16  ;;  %v50_v20 = vld [vmem:[#allocation4] sm:$0xff]  ;;  %v63_v24 = vld [vmem:[%s564_s3] sm:$0x7] }
  0x39   :  { %p230_p5 = scmp.gt.f32.partialorder %s528_s27, 0.5  ;;  %308 = vmatpush1.bf16.msra.mxu0 %v307_v10  ;;  %v76_v27 = vrot.slane %v63_v24, %v75_v23  ;;  %v68_v28 = vrot.slane %v63_v24, %v67_v25  ;;  %v72_v31 = vrot.slane %v63_v24, %v71_v26 }
  0x3a   :  { %310 = vmatprep.subr.bf16.mxu0 %v309_v18  ;;  %v225_v30 = vstv %s49_s2 }
  0x3b   :  { %318 = vmatpush3.bf16.msra.mxu1 %v317_v14 }
  0x3d   :  { %312 = vmatpush1.bf16.msra.mxu0 %v311_v19 }
  0x3e   :  { %303 = vmatmul.mubr.msk.f32.vlgmr.msra.gmra.mrb[0].mxu1 %vm80_vm1, %v50_v20 }
  0x40   :  { %284 = vmatmul.mubr.msk.f32.vlgmr.msra.gmra.mrb[0].mxu0 %vm80_vm1, %v50_v20 }
 0x110   :  { %233 = sbr.rel (!%p230_p5) target bundleno = 306 (0x132), region = 25 }
 0x111   :  { %v221_v29 = vpop.f32.mrb[0].mxu1 }
 0x112   :  { %v222_v32 = vadd.f32 %v221_v29, %v76_v27  ;;  %v304_v33 = vpop.f32.mrb[1].mxu1 }
 0x113   :  { %v150_v34 = vpop.f32.mrb[0].mxu0 }
 0x114   :  { %vm226_vm2 = vcmp.gt.f32.partialorder %v222_v32, %v225_v30  ;;  %v151_v35 = vadd.f32 %v150_v34, %v68_v28  ;;  %v152_v36 = vpop.f32.mrb[1].mxu0 }
 0x115   :  { %v227_v37 = vsel %vm226_vm2, 1.0, %v452_v1  ;;  %v153_v38 = vadd.f32 %v152_v36, %v72_v31 }
 0x116   :  { %228 = vst [vmem:[#allocation10] sm:$0xff] %v227_v37  ;;  %v287_v39 = vmul.f32 (%p230_p5), -1.442695, %v151_v35 }
 0x117   :  { %v288_v40 = vmul.f32 -1.442695, %v153_v38 }
 0x118   :  { %329 = vpow2.f32 %v287_v39 }
 0x119   :  { %331 = vpow2.f32 %v288_v40 }
 0x122   :  { %v330_v41 = vpop.eup %329 }
 0x123   :  { %v332_v42 = vpop.eup %331  ;;  %v240_v43 = vadd.f32 1.0, %v330_v41 }
 0x124   :  { %v241_v44 = vadd.f32 1.0, %v332_v42 }
 0x125   :  { %333 = vrcp.f32 %v240_v43 }
 0x126   :  { %335 = vrcp.f32 %v241_v44 }
 0x12f   :  { %v334_v45 = vpop.eup %333 }
 0x130   :  { %v336_v46 = vpop.eup %335  ;;  %246 = vst [vmem:[#allocation9] sm:$0xff] %v334_v45 }
 0x131   :  { %247 = vst [vmem:[#allocation9 + $0x8] sm:$0xff] %v336_v46 }
 0x132 PF:  { %p248_p6 = scmp.le.f32.partialorder %s528_s27, 0.5 }
 0x133   :  { %252 = vst [vmem:[#allocation9] sm:$0xff] (%p248_p6), %v151_v35  ;;  %253 = vst [vmem:[#allocation9 + $0x8] sm:$0xff] (%p248_p6), %v153_v38 }
 0x134   :  { %251 = sbr.rel (!%p248_p6) target bundleno = 315 (0x13b), region = 29 }
 0x13b PF:  { %s453_s3 = smov [#allocation9]   ;;  %s454_s6 = smov [#allocation10]  }
 0x13c   :  { %s260_s30 = sshll.u32 %s453_s3, 4  ;;  %s270_s7 = sshll.u32 %s454_s6, 4  ;;  %s261_s30 = int_to_ptr.vmem [resolvable:$true] %s260_s30  ;;  %s271_s7 = int_to_ptr.vmem [resolvable:$true] %s270_s7 }
 0x13d   :  { %s391_s8 = scalar_lea.vmem %s261_s30, 256  ;;  %p396_p8 = scmp.lt.s32.totalorder %s261_s30, %s261_s30 }
 0x13e   :  { %p392_p7 = scmp.ne.s32.totalorder %s261_s30, %s391_s8  ;;  %p397_p9 = scmp.lt.s32.totalorder %s391_s8, %s391_s8 }
 0x140   :  { %p398_p10 = por %p397_p9, %p396_p8 }
 0x142   :  { %p399_p11 = pnand %p398_p10, %p392_p7 }
 0x144   :  { %402 = shalt.err (!%p399_p11)
}
 0x145   :  { %s403_s0 = scalar_lea.hbm %s565_s4, 256 }
 0x146   :  { %p404_p12 = scmp.ne.s32.totalorder %s565_s4, %s403_s0  ;;  %p407_p13 = scmp.lt.u32.totalorder %s403_s0, %s565_s4 }
 0x148   :  { %p409_p0 = pnand %p407_p13, %p404_p12 }
 0x14a   :  { %412 = shalt.err (!%p409_p0)
}
 0x14b   :  { %263 = dma.vmem_to_hbm [thread:$0]  %s261_s30, 256, %s565_s4, [#allocation6]  }
 0x14c   :  { %s413_s17 = scalar_lea.vmem %s271_s7, 128  ;;  %p418_p2 = scmp.lt.s32.totalorder %s271_s7, %s271_s7 }
 0x14d   :  { %p414_p1 = scmp.ne.s32.totalorder %s271_s7, %s413_s17  ;;  %p419_p3 = scmp.lt.s32.totalorder %s413_s17, %s413_s17 }
 0x14f   :  { %p420_p4 = por %p419_p3, %p418_p2 }
 0x151   :  { %p421_p5 = pnand %p420_p4, %p414_p1 }
 0x153   :  { %424 = shalt.err (!%p421_p5)
}
 0x154   :  { %s425_s20 = scalar_lea.hbm %s566_s5, 128 }
 0x155   :  { %p426_p6 = scmp.ne.s32.totalorder %s566_s5, %s425_s20  ;;  %p429_p7 = scmp.lt.u32.totalorder %s425_s20, %s566_s5 }
 0x157   :  { %p431_p8 = pnand %p429_p7, %p426_p6 }
 0x159   :  { %434 = shalt.err (!%p431_p8)
}
 0x15a   :  { %273 = dma.vmem_to_hbm [thread:$0]  %s271_s7, 128, %s566_s5, [#allocation11]  }
 0x15b   :  { %441 = dma.done.wait [#allocation6], 256  }
 0x15c   :  { %442 = vsyncadd [#allocation6], 4294967040 }
 0x15d   :  { %443 = dma.done.wait [#allocation11], 128  }
 0x15e   :  { %444 = vsyncadd [#allocation11], 4294967168 }
 0x15f   :  { %280 = vsyncpa [#allocation5], 1 }
 0x160   :  { %281 = vsyncpa [#allocation8], 1 }
 0x161   :  { %282 = vsyncpa [#allocation6], 1 }
 0x162   :  { %283 = vsyncpa [#allocation11], 1 }

</bundles_post_ra>
